<compile_context>
chip_gen: v6e
topology: v6e:2x2x1
jax: 0.10.0
libtpu: 0.0.40
codegen_flags: <defaults>
</compile_context>

<pallas_src>
import math
import functools

import jax
import jax.numpy as jnp
from jax import lax
from jax.experimental import pallas as pl
from jax.experimental.pallas import tpu as pltpu

VOCAB = 768                      # fixed by the module: nn.Linear(hidden_size, 768)
_INV_SQRT2 = 1.0 / math.sqrt(2.0)
_TANH_C = math.sqrt(2.0 / math.pi)


def _round_up(a, b):
    return (a + b - 1) // b * b


def _vmem_cap_bytes():
    """Generation-aware VMEM budget with headroom (v5e/v6e 128 MiB, v7x 64 MiB)."""
    try:
        cap = int(pltpu.get_tpu_info().vmem_capacity_bytes)
    except Exception:
        cap = 64 * 1024 * 1024   # conservative fallback (v7x per-core)
    return int(cap * 0.85)


def _head_kernel(x_ref, w1_ref, b1_ref, g_ref, beta_ref, w2_ref, b2_ref,
                 o_ref, *, eps, approx_gelu, act_compute_dtype):
    # x: (tm, H)   w1: (H, H)   b1/g/beta: (1, H)   w2: (H, V)   b2: (1, V)

    # dense: Linear(H, H) on the MXU, f32 accumulation.
    h = jnp.dot(x_ref[...], w1_ref[...], preferred_element_type=jnp.float32)
    h = h + b1_ref[...].astype(jnp.float32)

    # GELU.  act_compute_dtype is bf16 when the activations are bf16 (halves
    # VALU work on v6e/v7x); approx_gelu=True uses the tanh form so the
    # transcendental lands on the EUP slot instead of an erf VALU polynomial.
    hh = h.astype(act_compute_dtype)
    if approx_gelu:
        g_act = 0.5 * hh * (1.0 + jnp.tanh(_TANH_C * (hh + 0.044715 * (hh * hh * hh))))
    else:
        g_act = hh * (0.5 * (1.0 + lax.erf(hh * _INV_SQRT2)))
    h = g_act.astype(jnp.float32)

    # LayerNorm over last dim — statistics kept in f32 (biased variance, +eps).
    mean = jnp.mean(h, axis=-1, keepdims=True)
    cent = h - mean
    var = jnp.mean(cent * cent, axis=-1, keepdims=True)
    h = cent * lax.rsqrt(var + eps)
    h = h * g_ref[...].astype(jnp.float32) + beta_ref[...].astype(jnp.float32)

    # decoder: Linear(H, 768) + tied bias.  Cast normalized activations to the
    # weight dtype (no-op for f32, keeps MXU inputs narrow for bf16 weights).
    y = jnp.dot(h.astype(w2_ref.dtype), w2_ref[...],
                preferred_element_type=jnp.float32)
    y = y + b2_ref[...].astype(jnp.float32)
    o_ref[...] = y.astype(o_ref.dtype)


def visual_lm_prediction_head(x, params, *, eps=1e-12, tm=512,
                              gelu_approximate=False):
    """x: [B, S, H].  Returns [B, S, 768]."""
    B, S, H = x.shape
    M = B * S
    x2 = x.reshape(M, H)

    # MXU dtype alignment: feed both matmuls operands in the activation dtype
    # so bf16 activations hit the bf16 MXU path (and halve weight VMEM).
    w_dtype = x.dtype
    w1 = params["dense_w"].astype(w_dtype)                # [H, H]   ([in, out])
    w2 = params["dec_w"].astype(w_dtype)                  # [H, VOCAB]
    b1 = params["dense_b"].reshape(1, H)
    gamma = params["ln_gamma"].reshape(1, H)
    beta = params["ln_beta"].reshape(1, H)
    b2 = params["dec_b"].reshape(1, VOCAB)

    x_it = jnp.dtype(x.dtype).itemsize
    w_it = jnp.dtype(w_dtype).itemsize
    o_it = x_it
    cap = _vmem_cap_bytes()

    def plan_bytes(t):
        act = 2 * t * H * x_it + 2 * t * VOCAB * o_it        # x / out tiles, double-buffered
        wts = (H * H + H * VOCAB) * w_it                     # weights, single-buffered
        rows = (3 * H + VOCAB) * 4                           # bias / LN rows (upper bound)
        f32tmp = (4 * t * H + 2 * t * VOCAB) * 4             # h, LN temps, y, cast copies
        return act + wts + rows + f32tmp

    # Row tile: as large as requested, but (a) small enough that the grid has
    # >= 2 steps when M allows (feeds both v7x TensorCores, enables pipelining)
    # and (b) small enough that the VMEM plan fits the generation cap.
    tm_eff = min(_round_up(tm, 8), max(8, _round_up(pl.cdiv(M, 2), 8)))
    while tm_eff > 8 and plan_bytes(tm_eff) > cap:
        tm_eff = max(8, _round_up(tm_eff // 2, 8))
    # TODO(synk): if the weights alone (H*H + H*768) exceed the VMEM cap (very
    # large H on v7x's 64 MiB), add a K-tiling grid axis over the dense matmul
    # with an f32 accumulator scratch (zero at k==0, GELU/LN/decoder at k==last).

    grid = (pl.cdiv(M, tm_eff),)   # ragged last block: OOB output writes are masked

    vmem_limit = int(min(max(int(plan_bytes(tm_eff) * 1.25), 16 * 1024 * 1024), cap))

    cost = pl.CostEstimate(
        flops=2 * M * H * H + 2 * M * H * VOCAB,
        transcendentals=M * H,
        bytes_accessed=(M * H * x_it + (H * H + H * VOCAB) * w_it
                        + M * VOCAB * o_it + (3 * H + VOCAB) * 4))

    act_compute_dtype = jnp.bfloat16 if x.dtype == jnp.bfloat16 else jnp.float32

    _invariant = lambda i: (0, 0)

    def _resident_spec(shape):
        # Grid-invariant operand: constant index_map + single buffering.
        return pl.BlockSpec(shape, _invariant, pipeline_mode=pl.Buffered(1))

    out = pl.pallas_call(
        functools.partial(_head_kernel, eps=eps, approx_gelu=gelu_approximate,
                          act_compute_dtype=act_compute_dtype),
        out_shape=jax.ShapeDtypeStruct((M, VOCAB), x.dtype),
        grid_spec=pltpu.PrefetchScalarGridSpec(
            num_scalar_prefetch=0,
            grid=grid,
            in_specs=[
                pl.BlockSpec((tm_eff, H), lambda i: (i, 0)),   # x rows
                _resident_spec((H, H)),                        # dense W
                _resident_spec((1, H)),                        # dense b
                _resident_spec((1, H)),                        # LN gamma
                _resident_spec((1, H)),                        # LN beta
                _resident_spec((H, VOCAB)),                    # decoder W
                _resident_spec((1, VOCAB)),                    # decoder b (tied bias)
            ],
            out_specs=pl.BlockSpec((tm_eff, VOCAB), lambda i: (i, 0)),
        ),
        compiler_params=pltpu.CompilerParams(
            dimension_semantics=("parallel",),
            vmem_limit_bytes=vmem_limit),
        cost_estimate=cost,
    )(x2, w1, b1, gamma, beta, w2, b2)

    return out.reshape(B, S, VOCAB)


def _reference(x, params, eps=1e-12):
    """Pure-JAX reference for correctness check (exact erf GELU, as in PyTorch)."""
    h = x @ params["dense_w"] + params["dense_b"]
    h = h * 0.5 * (1.0 + lax.erf(h / jnp.sqrt(2.0)))
    mean = jnp.mean(h, axis=-1, keepdims=True)
    var = jnp.mean((h - mean) ** 2, axis=-1, keepdims=True)
    h = (h - mean) * lax.rsqrt(var + eps)
    h = h * params["ln_gamma"] + params["ln_beta"]
    return h @ params["dec_w"] + params["dec_b"]


if __name__ == "__main__":
    B, S, H = 2, 8, 32
    key = jax.random.PRNGKey(0)
    k_x, k_w1, k_b1, k_w2 = jax.random.split(key, 4)

    x = jax.random.normal(k_x, (B, S, H), dtype=jnp.float32)

    params = {
        # dense Linear(H, H): stored as [in, out]
        "dense_w": jax.random.normal(k_w1, (H, H), dtype=jnp.float32) * 0.05,
        "dense_b": jax.random.normal(k_b1, (H,), dtype=jnp.float32) * 0.05,
        # LayerNorm params (PyTorch default init: ones / zeros)
        "ln_gamma": jnp.ones((H,), dtype=jnp.float32),
        "ln_beta": jnp.zeros((H,), dtype=jnp.float32),
        # decoder Linear(H, 768): stored as [in, out]; tied bias inits to zeros
        "dec_w": jax.random.normal(k_w2, (H, VOCAB), dtype=jnp.float32) * 0.05,
        "dec_b": jnp.zeros((VOCAB,), dtype=jnp.float32),
    }

    y = visual_lm_prediction_head(x, params)
    y = jax.block_until_ready(y)

    y_ref = _reference(x, params)
    assert y.shape == (B, S, VOCAB), y.shape
    assert jnp.allclose(y, y_ref, atol=1e-4, rtol=1e-4), "mismatch vs reference"
    print("KERNEL_OK")
</pallas_src>

<mosaic_0001>
module attributes {stable_mosaic.version = 11 : i64} {
  func.func @_head_kernel(%arg0: i32, %arg1: memref<8x32xf32, #tpu.memory_space<vmem>>, %arg2: memref<32x32xf32, #tpu.memory_space<vmem>>, %arg3: memref<1x32xf32, #tpu.memory_space<vmem>>, %arg4: memref<1x32xf32, #tpu.memory_space<vmem>>, %arg5: memref<1x32xf32, #tpu.memory_space<vmem>>, %arg6: memref<32x768xf32, #tpu.memory_space<vmem>>, %arg7: memref<1x768xf32, #tpu.memory_space<vmem>>, %arg8: memref<8x768xf32, #tpu.memory_space<vmem>>) attributes {dimension_semantics = [#tpu.dimension_semantics<parallel>], iteration_bounds = array<i64: 2>, scalar_prefetch = 0 : i64, scratch_operands = 0 : i64, tpu.core_type = #tpu.core_type<tc>, window_params = [{transform_indices = @transform_0, window_bounds = array<i64: 8, 32>}, {pipeline_mode = #tpu.pipeline_mode<synchronous>, transform_indices = @transform_1, window_bounds = array<i64: 32, 32>}, {pipeline_mode = #tpu.pipeline_mode<synchronous>, transform_indices = @transform_2, window_bounds = array<i64: 1, 32>}, {pipeline_mode = #tpu.pipeline_mode<synchronous>, transform_indices = @transform_3, window_bounds = array<i64: 1, 32>}, {pipeline_mode = #tpu.pipeline_mode<synchronous>, transform_indices = @transform_4, window_bounds = array<i64: 1, 32>}, {pipeline_mode = #tpu.pipeline_mode<synchronous>, transform_indices = @transform_5, window_bounds = array<i64: 32, 768>}, {pipeline_mode = #tpu.pipeline_mode<synchronous>, transform_indices = @transform_6, window_bounds = array<i64: 1, 768>}, {transform_indices = @transform_7, window_bounds = array<i64: 8, 768>}]} {
    %c0 = arith.constant 0 : index
    %c0_0 = arith.constant 0 : index
    %0 = vector.load %arg1[%c0, %c0_0] : memref<8x32xf32, #tpu.memory_space<vmem>>, vector<8x32xf32>
    %c0_1 = arith.constant 0 : index
    %c0_2 = arith.constant 0 : index
    %1 = vector.load %arg2[%c0_1, %c0_2] : memref<32x32xf32, #tpu.memory_space<vmem>>, vector<32x32xf32>
    %cst = arith.constant dense<0.000000e+00> : vector<8x32xf32>
    %2 = tpu.matmul %0, %1, %cst {dimension_numbers = #tpu.dot_dimension_numbers<[1], [0], [0], [1], [0, 0, 1, 1], [], []>} : vector<8x32xf32>, vector<32x32xf32>, vector<8x32xf32> -> vector<8x32xf32>
    %c0_3 = arith.constant 0 : index
    %c0_4 = arith.constant 0 : index
    %3 = vector.load %arg3[%c0_3, %c0_4] : memref<1x32xf32, #tpu.memory_space<vmem>>, vector<1x32xf32>
    %4 = vector.broadcast %3 : vector<1x32xf32> to vector<8x32xf32>
    %5 = arith.addf %2, %4 : vector<8x32xf32>
    %cst_5 = arith.constant 0.707106769 : f32
    %6 = vector.broadcast %cst_5 : f32 to vector<8x32xf32>
    %7 = arith.mulf %5, %6 : vector<8x32xf32>
    %8 = math.erf %7 : vector<8x32xf32>
    %cst_6 = arith.constant 1.000000e+00 : f32
    %9 = vector.broadcast %cst_6 : f32 to vector<8x32xf32>
    %10 = arith.addf %9, %8 : vector<8x32xf32>
    %cst_7 = arith.constant 5.000000e-01 : f32
    %11 = vector.broadcast %cst_7 : f32 to vector<8x32xf32>
    %12 = arith.mulf %11, %10 : vector<8x32xf32>
    %13 = arith.mulf %5, %12 : vector<8x32xf32>
    %cst_8 = arith.constant dense<0.000000e+00> : vector<8xf32>
    %14 = vector.multi_reduction <add>, %13, %cst_8 [1] : vector<8x32xf32> to vector<8xf32>
    %15 = vector.shape_cast %14 : vector<8xf32> to vector<8x1xf32>
    %cst_9 = arith.constant 3.200000e+01 : f32
    %16 = vector.broadcast %cst_9 : f32 to vector<8x1xf32>
    %17 = arith.divf %15, %16 : vector<8x1xf32>
    %18 = vector.broadcast %17 : vector<8x1xf32> to vector<8x32xf32>
    %19 = arith.subf %13, %18 : vector<8x32xf32>
    %20 = arith.mulf %19, %19 : vector<8x32xf32>
    %cst_10 = arith.constant dense<0.000000e+00> : vector<8xf32>
    %21 = vector.multi_reduction <add>, %20, %cst_10 [1] : vector<8x32xf32> to vector<8xf32>
    %22 = vector.shape_cast %21 : vector<8xf32> to vector<8x1xf32>
    %cst_11 = arith.constant 3.200000e+01 : f32
    %23 = vector.broadcast %cst_11 : f32 to vector<8x1xf32>
    %24 = arith.divf %22, %23 : vector<8x1xf32>
    %cst_12 = arith.constant 9.99999996E-13 : f32
    %25 = vector.broadcast %cst_12 : f32 to vector<8x1xf32>
    %26 = arith.addf %24, %25 : vector<8x1xf32>
    %27 = math.rsqrt %26 : vector<8x1xf32>
    %28 = vector.broadcast %27 : vector<8x1xf32> to vector<8x32xf32>
    %29 = arith.mulf %19, %28 : vector<8x32xf32>
    %c0_13 = arith.constant 0 : index
    %c0_14 = arith.constant 0 : index
    %30 = vector.load %arg4[%c0_13, %c0_14] : memref<1x32xf32, #tpu.memory_space<vmem>>, vector<1x32xf32>
    %31 = vector.broadcast %30 : vector<1x32xf32> to vector<8x32xf32>
    %32 = arith.mulf %29, %31 : vector<8x32xf32>
    %c0_15 = arith.constant 0 : index
    %c0_16 = arith.constant 0 : index
    %33 = vector.load %arg5[%c0_15, %c0_16] : memref<1x32xf32, #tpu.memory_space<vmem>>, vector<1x32xf32>
    %34 = vector.broadcast %33 : vector<1x32xf32> to vector<8x32xf32>
    %35 = arith.addf %32, %34 : vector<8x32xf32>
    %c0_17 = arith.constant 0 : index
    %c0_18 = arith.constant 0 : index
    %36 = vector.load %arg6[%c0_17, %c0_18] : memref<32x768xf32, #tpu.memory_space<vmem>>, vector<32x768xf32>
    %cst_19 = arith.constant dense<0.000000e+00> : vector<8x768xf32>
    %37 = tpu.matmul %35, %36, %cst_19 {dimension_numbers = #tpu.dot_dimension_numbers<[1], [0], [0], [1], [0, 0, 1, 1], [], []>} : vector<8x32xf32>, vector<32x768xf32>, vector<8x768xf32> -> vector<8x768xf32>
    %c0_20 = arith.constant 0 : index
    %c0_21 = arith.constant 0 : index
    %38 = vector.load %arg7[%c0_20, %c0_21] : memref<1x768xf32, #tpu.memory_space<vmem>>, vector<1x768xf32>
    %39 = vector.broadcast %38 : vector<1x768xf32> to vector<8x768xf32>
    %40 = arith.addf %37, %39 : vector<8x768xf32>
    %c0_22 = arith.constant 0 : index
    %c0_23 = arith.constant 0 : index
    %41 = vector.load %arg8[%c0_22, %c0_23] : memref<8x768xf32, #tpu.memory_space<vmem>>, vector<8x768xf32>
    tpu.vector_store %arg8[%c0_22, %c0_23], %40 {strides = array<i32>} : memref<8x768xf32, #tpu.memory_space<vmem>>, vector<8x768xf32>,
    return
  }
  func.func @transform_0(%arg0: i32) -> (i32, i32) {
    %c0_i32 = arith.constant 0 : i32
    %c0_i32_0 = arith.constant 0 : i32
    return %arg0, %c0_i32 : i32, i32
  }
  func.func @transform_1(%arg0: i32) -> (i32, i32) {
    %c0_i32 = arith.constant 0 : i32
    %c0_i32_0 = arith.constant 0 : i32
    %c0_i32_1 = arith.constant 0 : i32
    return %c0_i32, %c0_i32_0 : i32, i32
  }
  func.func @transform_2(%arg0: i32) -> (i32, i32) {
    %c0_i32 = arith.constant 0 : i32
    %c0_i32_0 = arith.constant 0 : i32
    %c0_i32_1 = arith.constant 0 : i32
    return %c0_i32, %c0_i32_0 : i32, i32
  }
  func.func @transform_3(%arg0: i32) -> (i32, i32) {
    %c0_i32 = arith.constant 0 : i32
    %c0_i32_0 = arith.constant 0 : i32
    %c0_i32_1 = arith.constant 0 : i32
    return %c0_i32, %c0_i32_0 : i32, i32
  }
  func.func @transform_4(%arg0: i32) -> (i32, i32) {
    %c0_i32 = arith.constant 0 : i32
    %c0_i32_0 = arith.constant 0 : i32
    %c0_i32_1 = arith.constant 0 : i32
    return %c0_i32, %c0_i32_0 : i32, i32
  }
  func.func @transform_5(%arg0: i32) -> (i32, i32) {
    %c0_i32 = arith.constant 0 : i32
    %c0_i32_0 = arith.constant 0 : i32
    %c0_i32_1 = arith.constant 0 : i32
    return %c0_i32, %c0_i32_0 : i32, i32
  }
  func.func @transform_6(%arg0: i32) -> (i32, i32) {
    %c0_i32 = arith.constant 0 : i32
    %c0_i32_0 = arith.constant 0 : i32
    %c0_i32_1 = arith.constant 0 : i32
    return %c0_i32, %c0_i32_0 : i32, i32
  }
  func.func @transform_7(%arg0: i32) -> (i32, i32) {
    %c0_i32 = arith.constant 0 : i32
    %c0_i32_0 = arith.constant 0 : i32
    return %arg0, %c0_i32 : i32, i32
  }
}

</mosaic_0001>

<bundles_post_ra>
// kernel: tpu_custom_call.1
= control target key start
LH: loop header
LB: loop body
LE: loop exit
PB: predicated region body
PF: predicated region fallthrough
CT: control target
= control target key end

     0   :  { %s1334_s0 = inlined_call_operand.hbm [shape: f32[16,32], index: 0, kind: input, shape index: {}]   ;;  %s1335_s1 = inlined_call_operand.hbm [shape: f32[32,32], index: 1, kind: input, shape index: {}]   ;;  %s1336_s2 = inlined_call_operand.vmem [shape: f32[1,32], index: 2, kind: input, shape index: {}]   ;;  %s1337_s3 = inlined_call_operand.vmem [shape: f32[1,32], index: 3, kind: input, shape index: {}]   ;;  %s1338_s4 = inlined_call_operand.vmem [shape: f32[1,32], index: 4, kind: input, shape index: {}]   ;;  %s1339_s5 = inlined_call_operand.hbm [shape: f32[32,768], index: 5, kind: input, shape index: {}]   ;;  %s1340_s6 = inlined_call_operand.vmem [shape: f32[1,768], index: 6, kind: input, shape index: {}]   ;;  %s1341_s7 = inlined_call_operand.hbm [shape: f32[16,768], index: 7, kind: output, shape index: {}]  }
   0x1   :  { %1346 = sst [smem:[#allocation12_spill]] %s1335_s1 }
   0x2   :  { %1347 = sst [smem:[#allocation13_spill]] %s1339_s5 }
   0x3   :  { %12 = vsyncpa [#allocation3], 0 }
   0x4   :  { %14 = vsyncpa [#allocation3 + $0x1], 0 }
   0x5   :  { %15 = vsyncpa [#allocation6], 0 }
   0x6   :  { %16 = vsyncpa [#allocation4], 0 }
   0x7   :  { %18 = vsyncpa [#allocation4 + $0x1], 0  ;;  %s1142_s24 = smov 0   ;;  %s1144_s25 = smov 0  }
   0x8   :  { %s1146_s26 = smov 0   ;;  %s1148_s27 = smov 0  }
   0x9 LB: > { %s1163_s28 = sadd.s32 4294967295, %s1090_s27   ;;  %s826_s29 = sadd.s32 4294967294, %s1090_s27   ;;  %s1090_s27 = sphi %s1148_s27, %s1367_s27   ;;  %s1086_s26 = sphi %s1146_s26, %s1366_s26   ;;  %s1082_s25 = sphi %s1144_s25, %s1365_s25   ;;  %s1078_s24 = sphi %s1142_s24, %s1364_s24  }
   0xa   : > { %p44_p0 = scmp.ne.s32.totalorder %s1082_s25, %s1078_s24  ;;  %p1342_p1 = scmp.eq.s32.totalorder %s1163_s28, 0 }
   0xb   : > { %p200_p3 = scmp.eq.s32.totalorder %s826_s29, 1  ;;  %p827_p5 = scmp.ge.s32.totalorder %s1090_s27, 1 }
   0xc   : > { %p1172_p4 = por %p1342_p1, %p44_p0  ;;  %p207_p7 = scmp.lt.s32.totalorder %s1090_s27, 3 }
   0xd   : > { %p1177_p6 = por %p200_p3, %p44_p0  ;;  %s1092_s10 = smov [#allocation5]  }
   0xe   : > { %s1348_s30 = scalar_select %p1172_p4, 1, 0 }
   0xf   : > { %s1349_s8 = scalar_select %p1177_p6, 1, 0 }
  0x10   : > { %p1182_p8 = pnand %p827_p5, %p207_p7  ;;  %s219_s11 = sshll.u32 %s1092_s10, 4  ;;  %s220_s11 = int_to_ptr.vmem [resolvable:$true] %s219_s11 }
  0x11   : > { %s1093_s13 = smov [#allocation7]   ;;  %s953_s15 = scalar_lea.vmem %s220_s11, 512 }
  0x12   : > { %s1350_s9 = scalar_select %p1182_p8, 1, 0 }
  0x13   : > { %p877_p9 = pneg %p1182_p8  ;;  %s241_s14 = sshll.u32 %s1093_s13, 4  ;;  %s242_s14 = int_to_ptr.vmem [resolvable:$true] %s241_s14 }
  0x14   : > { %p954_p13 = scmp.ne.s32.totalorder %s220_s11, %s953_s15  ;;  %p961_p5 = scmp.lt.s32.totalorder %s220_s11, %s220_s11 }
  0x15   : > { %p1191_p11 = pnand %p877_p9, %p1342_p1  ;;  %p962_p7 = scmp.lt.s32.totalorder %s953_s15, %s953_s15 }
  0x17   : > { %p944_p12 = pneg %p1191_p11  ;;  %p963_p10 = por %p962_p7, %p961_p5 }
  0x19   : > { %p956_p0 = pnand %p954_p13, %p944_p12 }
  0x1b   : > { %p957_p3 = pneg %p956_p0 }
  0x1d   : > { %p964_p9 = pnand %p963_p10, %p957_p3 }
  0x1f   : > { %967 = shalt.err (!%p964_p9)
}
  0x20   : > { %s1094_s16 = smov 128   ;;  %s1095_s17 = smov 8  }
  0x21   : > { %s1352_s1 = sld [smem:[#allocation12_spill]]  ;;  %s979_s20 = scalar_lea.vmem %s242_s14, 3072 }
  0x22   : > { %p980_p1 = scmp.ne.s32.totalorder %s242_s14, %s979_s20  ;;  %p987_p2 = scmp.lt.s32.totalorder %s242_s14, %s242_s14 }
  0x23   : > { %p988_p6 = scmp.lt.s32.totalorder %s979_s20, %s979_s20 }
  0x24   : > { %p982_p13 = pnand %p980_p1, %p944_p12 }
  0x25   : > { %p989_p5 = por %p988_p6, %p987_p2 }
  0x26   : > { %p983_p0 = pneg %p982_p13 }
  0x27   : > { %880 = dma.hbm_to_vmem [thread:$0]  (!%p1191_p11), %s1352_s1, 512, %s220_s11, [#allocation6], %s1094_s16, %s1094_s16, %s1095_s17  }
  0x28   : > { %p990_p10 = pnand %p989_p5, %p983_p0 }
  0x2a   : > { %993 = shalt.err (!%p990_p10)
}
  0x2b   : > { %s1096_s21 = smov 768   ;;  %s1097_s22 = smov 48  }
  0x2c   : > { %s1353_s5 = sld [smem:[#allocation13_spill]]  ;;  %s1214_s10 = sadd.s32 1, %s1090_s27  }
  0x2d   : > { %s28_s11 = ssub.s32 %s1090_s27, %s1214_s10  ;;  %s31_s13 = sadd.s32 1, %s1086_s26 }
  0x2e   : > { %p29_p1 = scmp.eq.s32.totalorder %s28_s11, 0  ;;  %p38_p2 = scmp.ne.s32.totalorder %s1086_s26, %s1082_s25 }
  0x2f   : > { %p39_p6 = scmp.eq.s32.totalorder %s1090_s27, 0  ;;  %p1354_p3 = scmp.eq.s32.totalorder %s1163_s28, 1 }
  0x30   : > { %s1223_s15 = scalar_select %p29_p1, %s1086_s26, %s31_s13  }
  0x31   : > { %p40_p12 = por %p39_p6, %p38_p2  ;;  %p1227_p7 = por %p1354_p3, %p38_p2 }
  0x32   : > { %883 = dma.hbm_to_vmem [thread:$0]  (!%p1191_p11), %s1353_s5, 3072, %s242_s14, [#allocation6], %s1096_s21, %s1096_s21, %s1097_s22  }
  0x33   : > { %s1355_s16 = scalar_select %p1227_p7, 1, 0 }
  0x34   : > { %p894_p9 = scmp.lt.s32.totalorder %s1090_s27, 2  ;;  %s258_s12 = sand.u32 1, %s1086_s26  }
  0x35   : > { %s831_s17 = sshll.u32 %s258_s12, 3  ;;  %s832_s14 = sshll.u32 %s1090_s27, 7 }
  0x36   : > { %s1237_s20 = scalar_lea.hbm %s1334_s0, %s832_s14  ;;  %s262_s21 = scalar_lea.vmem [#allocation2], %s831_s17 }
  0x37   : > { %s269_s22 = sshll.u32 %s262_s21, 4  ;;  %p1239_p11 = pnand %p894_p9, %p40_p12  ;;  %s270_s22 = int_to_ptr.vmem [resolvable:$true] %s269_s22 }
  0x38   : > { %s259_s29 = scalar_lea.sflag [#allocation3], %s258_s12  ;;  %s994_s11 = scalar_lea.hbm %s1237_s20, 128 }
  0x39   : > { %p995_p13 = scmp.ne.s32.totalorder %s1237_s20, %s994_s11  ;;  %p996_p0 = pneg %p1239_p11 }
  0x3a   : > { %s999_s18 = scalar_lea.hbm %s1334_s0, 256  ;;  %p1000_p1 = scmp.lt.s32.totalorder %s1237_s20, %s1334_s0 }
  0x3b   : > { %p997_p5 = pnand %p996_p0, %p995_p13  ;;  %p1001_p2 = scmp.lt.s32.totalorder %s999_s18, %s994_s11 }
  0x3d   : > { %p998_p10 = pneg %p997_p5  ;;  %p1002_p6 = por %p1001_p2, %p1000_p1 }
  0x3f   : > { %p1003_p12 = pnand %p1002_p6, %p998_p10 }
  0x41   : > { %1006 = shalt.err (!%p1003_p12)
}
  0x42   : > { %s1007_s21 = scalar_lea.vmem %s270_s22, 128  ;;  %s1098_s12 = smov [#allocation2]  }
  0x43   : > { %p1008_p3 = scmp.ne.s32.totalorder %s270_s22, %s1007_s21  ;;  %s1012_s1 = sshll.u32 %s1098_s12, 4  ;;  %s1013_s1 = int_to_ptr.vmem [resolvable:$false] %s1012_s1 }
  0x44   : > { %s1014_s5 = scalar_lea.vmem %s1013_s1, 256  ;;  %p1015_p13 = scmp.lt.s32.totalorder %s270_s22, %s1013_s1 }
  0x45   : > { %p1010_p9 = pnand %p1008_p3, %p996_p0  ;;  %p1016_p5 = scmp.lt.s32.totalorder %s1014_s5, %s1007_s21 }
  0x47   : > { %p1011_p7 = pneg %p1010_p9  ;;  %p1017_p4 = por %p1016_p5, %p1015_p13 }
  0x49   : > { %p1018_p8 = pnand %p1017_p4, %p1011_p7 }
  0x4b   : > { %1021 = shalt.err (!%p1018_p8)
}
  0x4c   : > { %887 = dma.hbm_to_vmem [thread:$0]  (!%p1239_p11), %s1237_s20, 128, %s270_s22, %s259_s29  }
  0x4d   : > { %p1357_p10 = scmp.ne.s32.totalorder %s1350_s9, 0 }
  0x4e   : > { %s1260_s11 = sand.u32 (!%p1357_p10), 1, %s1082_s25   ;;  %p1358_p0 = scmp.ne.s32.totalorder (!%p1357_p10), %s1348_s30, 0 }
  0x4f   : > { %278 = sbr.rel (%p1357_p10) target bundleno = 840 (0x348), region = 48  ;;  %s834_s13 = sshll.u32 (!%p1357_p10), %s1260_s11, 3 }
  0x50   : > { %s281_s14 = scalar_lea.sflag (!%p1357_p10), [#allocation3], %s1260_s11  ;;  %s284_s1 = scalar_lea.vmem (!%p1357_p10), [#allocation2], %s834_s13 }
  0x54   : > { %1065 = dma.done.wait (%p1358_p0), %s281_s14, 128  }
  0x55   : > { %1067 = vsyncadd (%p1358_p0), %s281_s14, 4294967168  ;;  %p1359_p4 = scmp.eq.s32.totalorder %s1163_s28, 0 }
  0x57   : > { %1069 = dma.done.wait (%p1359_p4), [#allocation6], 3584   ;;  %p1360_p8 = pmov %p1359_p4 }
  0x58   : > { %v1099_v0 = vmov 0.0   ;;  %vm1100_vm0 = vmmov 0   ;;  %v327_v1 = vld [vmem:[#allocation5 + $0x18] sm:$0xff]  ;;  %v326_v2 = vld [vmem:[#allocation5 + $0x10] sm:$0xff]  ;;  %v325_v3 = vld [vmem:[#allocation5 + $0x8] sm:$0xff]  ;;  %vm335_vm1 = vcmask 261120   ;;  %v470_v54 = vlaneseq }
  0x59   : > { %1071 = vsyncadd (%p1360_p8), [#allocation6], 4294963712  ;;  %852 = vmatprep.subr.mxu0 %v1099_v0  ;;  %860 = vmatprep.mubr.msk.f32.mxu0 %vm1100_vm0, %v1099_v0  ;;  %v324_v4 = vld [vmem:[#allocation5] sm:$0xff]  ;;  %v323_v5 = vld [vmem:[%s284_s1] sm:$0xff]  ;;  %s863_s19 = smul.u32 48, %s1260_s11  ;;  %s723_s5 = scalar_lea.sflag [#allocation4], %s1260_s11 }
  0x5a   : > { %567 = vmatprep.mubr.f32.mxu1 %v1099_v0  ;;  %853 = vmatpush3.msra.mxu0 %v327_v1  ;;  %v837_v6 = vld [vmem:[%s1336_s2] ss:$0 sm:$0xff]  ;;  %v463_v21 = vld [vmem:[#allocation7 + $0x98] sm:$0xff]  ;;  %v465_v23 = vld [vmem:[#allocation7 + $0xa8] sm:$0xff]  ;;  %v471_v55 = vshrl.u32 %v470_v54, 7  ;;  %s864_s21 = smul.u32 768, %s1163_s28 }
  0x5b   : > { %854 = vmatprep.subr.mxu0 %v1099_v0  ;;  %v462_v22 = vld [vmem:[#allocation7 + $0x90] sm:$0xff]  ;;  %527 = vmatprep.subr.mxu1 %v463_v21  ;;  %v457_v24 = vld [vmem:[#allocation7 + $0x68] sm:$0xff]  ;;  %v464_v25 = vld [vmem:[#allocation7 + $0xa0] sm:$0xff]  ;;  %s322_s17 = scalar_lea.vmem [#allocation8], %s863_s19  ;;  %p1361_p11 = scmp.ne.s32.totalorder %s1355_s16, 0 }
  0x5c   : > { %855 = vmatpush3.msra.mxu0 %v326_v2  ;;  %v456_v26 = vld [vmem:[#allocation7 + $0x60] sm:$0xff]  ;;  %528 = vmatpush1.msra.mxu1 %v462_v22  ;;  %v459_v27 = vld [vmem:[#allocation7 + $0x78] sm:$0xff]  ;;  %v458_v29 = vld [vmem:[#allocation7 + $0x70] sm:$0xff]  ;;  %v472_v56 = vsub.s32 0, %v471_v55  ;;  %v480_v57 = vsub.s32 2, %v471_v55  ;;  %v476_v59 = vsub.s32 1, %v471_v55  ;;  %s735_s1 = scalar_lea.hbm %s1341_s7, %s864_s21 }
  0x5d   : > { %856 = vmatprep.subr.mxu0 %v1099_v0  ;;  %v451_v28 = vld [vmem:[#allocation7 + $0x38] sm:$0xff]  ;;  %529 = vmatprep.subr.mxu1 %v457_v24  ;;  %v450_v30 = vld [vmem:[#allocation7 + $0x30] sm:$0xff]  ;;  %v453_v31 = vld [vmem:[#allocation7 + $0x48] sm:$0xff]  ;;  %v484_v60 = vsub.s32 3, %v471_v55  ;;  %s737_s12 = sshll.u32 %s322_s17, 4  ;;  %s1101_s9 = smov [#allocation8]   ;;  %s738_s12 = int_to_ptr.vmem [resolvable:$true] %s737_s12 }
  0x5e   : > { %857 = vmatpush3.msra.mxu0 %v325_v3  ;;  %530 = vmatpush1.msra.mxu1 %v456_v26  ;;  %v445_v32 = vld [vmem:[#allocation7 + $0x8] sm:$0xff]  ;;  %v452_v33 = vld [vmem:[#allocation7 + $0x40] sm:$0xff]  ;;  %v447_v34 = vld [vmem:[#allocation7 + $0x18] sm:$0xff]  ;;  %s1022_s30 = scalar_lea.vmem %s738_s12, 768  ;;  %s1026_s28 = sshll.u32 %s1101_s9, 4  ;;  %s1027_s28 = int_to_ptr.vmem [resolvable:$false] %s1026_s28 }
  0x5f   : > { %858 = vmatprep.subr.mxu0 %v1099_v0  ;;  %531 = vmatprep.subr.mxu1 %v451_v28  ;;  %v444_v35 = vld [vmem:[#allocation7] sm:$0xff]  ;;  %v446_v36 = vld [vmem:[#allocation7 + $0x10] sm:$0xff]  ;;  %v467_v37 = vld [vmem:[#allocation7 + $0xb8] sm:$0xff]  ;;  %p1023_p7 = scmp.ne.s32.totalorder %s738_s12, %s1022_s30  ;;  %s1028_s20 = scalar_lea.vmem %s1027_s28, 1536 }
  0x60   : > { %859 = vmatpush3.msra.mxu0 %v324_v4  ;;  %532 = vmatpush1.msra.mxu1 %v450_v30  ;;  %v839_v42 = vld [vmem:[%s1337_s3] ss:$0 sm:$0xff]  ;;  %v461_v48 = vld [vmem:[#allocation7 + $0x88] sm:$0xff]  ;;  %v460_v49 = vld [vmem:[#allocation7 + $0x80] sm:$0xff]  ;;  %p1029_p6 = scmp.lt.s32.totalorder %s738_s12, %s1027_s28  ;;  %p1030_p12 = scmp.lt.s32.totalorder %s1028_s20, %s1022_s30 }
  0x61   : > { %861 = vmatmul.mubr.msk.f32.vlgmr.msra.gmra.mxu0 %vm335_vm1, %v323_v5  ;;  %598 = vmatprep.subr.mxu0 %v465_v23  ;;  %v840_v44 = vld [vmem:[%s1338_s4] ss:$0 sm:$0xff]  ;;  %v455_v50 = vld [vmem:[#allocation7 + $0x58] sm:$0xff]  ;;  %v449_v52 = vld [vmem:[#allocation7 + $0x28] sm:$0xff]  ;;  %v488_v5 = vsub.s32 4, %v471_v55  ;;  %p1024_p1 = pnand %p1023_p7, %p1361_p11 }
  0x62   : > { %638 = vmatprep.mubr.f32.mxu0 %v1099_v0  ;;  %599 = vmatpush1.msra.mxu0 %v464_v25  ;;  %v466_v47 = vld [vmem:[#allocation7 + $0xb0] sm:$0xff]  ;;  %v448_v53 = vld [vmem:[#allocation7 + $0x20] sm:$0xff]  ;;  %p1031_p3 = por %p1030_p12, %p1029_p6 }
  0x63   : > { %600 = vmatprep.subr.mxu0 %v459_v27  ;;  %533 = vmatprep.subr.mxu1 %v445_v32  ;;  %v454_v51 = vld [vmem:[#allocation7 + $0x50] sm:$0xff]  ;;  %p1025_p2 = pneg %p1024_p1 }
  0x64   : > { %601 = vmatpush1.msra.mxu0 %v458_v29  ;;  %534 = vmatpush1.msra.mxu1 %v444_v35  ;;  %v468_v58 = vld [vmem:[%s1340_s6] sm:$0x3f] }
  0x65   : > { %602 = vmatprep.subr.mxu0 %v453_v31  ;;  %669 = vmatprep.subr.mxu1 %v467_v37  ;;  %v473_v61 = vrot.slane %v468_v58, %v472_v56  ;;  %v481_v62 = vrot.slane %v468_v58, %v480_v57  ;;  %v477_v63 = vrot.slane %v468_v58, %v476_v59  ;;  %p1032_p9 = pnand %p1031_p3, %p1025_p2 }
  0x66   : > { %603 = vmatpush1.msra.mxu0 %v452_v33 }
  0x67   : > { %604 = vmatprep.subr.mxu0 %v447_v34 }
  0x68   : > { %605 = vmatpush1.msra.mxu0 %v446_v36 }
 0x121   : > { %v405_v7 = vpop.f32.mrf.mxu0 }
 0x122   : > { %v406_v8 = vadd.f32 %v837_v6, %v405_v7 }
 0x123   : > { %v862_v9 = vpop.f32.mrf.mxu0 }
 0x124   : > { %v409_v10 = vmul.f32 0.70710677, %v406_v8 }
 0x126   : > { %938 = verf.f32 %v409_v10  ;;  %v492_v10 = vsub.s32 5, %v471_v55 }
 0x133   : > { %v939_v11 = vpop.eup %938 }
 0x134   : > { %v411_v12 = vadd.f32 1.0, %v939_v11  ;;  %v489_v11 = vrot.slane %v468_v58, %v488_v5 }
 0x136   : > { %v412_v13 = vmul.f32 0.5, %v411_v12  ;;  %v493_v12 = vrot.slane %v468_v58, %v492_v10 }
 0x138   : > { %v413_v14 = vmul.f32 %v412_v13, %v406_v8 }
 0x13a   : > { %v414_v15 = vsel %vm335_vm1, %v413_v14, 0.0 }
 0x13b   : > { %415 = vadd.xlane.f32.xlu0 %v414_v15 }
 0x1c4   : > { %v416_v16 = vpop.xlane.xlu0 %415 }
 0x1c5   : > { %v418_v17 = vmul.f32 0.03125, %v416_v16 }
 0x1c7   : > { %v419_v18 = vsub.f32 %v413_v14, %v418_v17 }
 0x1c9   : > { %v420_v19 = vmul.f32 %v419_v18, %v419_v18 }
 0x1cb   : > { %v421_v20 = vsel %vm335_vm1, %v420_v19, 0.0 }
 0x1cc   : > { %422 = vadd.xlane.f32.xlu0 %v421_v20 }
 0x255   : > { %v423_v38 = vpop.xlane.xlu0 %422 }
 0x256   : > { %v424_v39 = vmul.f32 0.03125, %v423_v38 }
 0x258   : > { %v425_v40 = vadd.f32 1e-12, %v424_v39 }
 0x25a   : > { %940 = vrsqrt.f32 %v425_v40 }
 0x267   : > { %v941_v41 = vpop.eup %940 }
 0x268   : > { %v427_v43 = vmul.f32 %v941_v41, %v419_v18 }
 0x26a   : > { %v435_v45 = vmul.f32 %v839_v42, %v427_v43 }
 0x26c   : > { %v443_v46 = vadd.f32 %v840_v44, %v435_v45 }
 0x26e   : > { %841 = vmatmul.mubr.msk.f32.vlgmr.msra.gmra.mxu1 %vm335_vm1, %v443_v46  ;;  %842 = vmatmul.mubr.msk.f32.vlgmr.msra.gmra.mxu0 %vm335_vm1, %v443_v46 }
 0x26f   : > { %670 = vmatpush1.msra.mxu1 %v466_v47  ;;  %709 = vmatprep.mubr.f32.mxu1 %v1099_v0  ;;  %v485_v0 = vrot.slane %v468_v58, %v484_v60 }
 0x270   : > { %671 = vmatprep.subr.mxu1 %v461_v48 }
 0x271   : > { %672 = vmatpush1.msra.mxu1 %v460_v49 }
 0x272   : > { %673 = vmatprep.subr.mxu1 %v455_v50 }
 0x273   : > { %674 = vmatpush1.msra.mxu1 %v454_v51 }
 0x274   : > { %675 = vmatprep.subr.mxu1 %v449_v52 }
 0x275   : > { %676 = vmatpush1.msra.mxu1 %v448_v53 }
 0x276   : > { %843 = vmatmul.mubr.msk.f32.vlgmr.msra.gmra.mxu1 %vm335_vm1, %v443_v46 }
 0x32e   : > { %v569_v1 = vpop.f32.mrf.mxu1  ;;  %v640_v2 = vpop.f32.mrf.mxu0 }
 0x32f   : > { %v570_v3 = vadd.f32 %v569_v1, %v473_v61  ;;  %v641_v4 = vadd.f32 %v640_v2, %v481_v62 }
 0x330   : > { %v571_v6 = vpop.f32.mrf.mxu1  ;;  %v642_v7 = vpop.f32.mrf.mxu0 }
 0x331   : > { %716 = vst [vmem:[%s322_s17] sm:$0xff] %v570_v3  ;;  %718 = vst [vmem:[%s322_s17 + $0x10] sm:$0xff] %v641_v4  ;;  %v572_v8 = vadd.f32 %v571_v6, %v477_v63  ;;  %v643_v9 = vadd.f32 %v642_v7, %v485_v0 }
 0x333   : > { %717 = vst [vmem:[%s322_s17 + $0x8] sm:$0xff] %v572_v8  ;;  %719 = vst [vmem:[%s322_s17 + $0x18] sm:$0xff] %v643_v9 }
 0x336   : > { %v711_v13 = vpop.f32.mrf.mxu1 }
 0x337   : > { %v712_v14 = vadd.f32 %v711_v13, %v489_v11 }
 0x338   : > { %v713_v15 = vpop.f32.mrf.mxu1 }
 0x339   : > { %720 = vst [vmem:[%s322_s17 + $0x20] sm:$0xff] %v712_v14  ;;  %v714_v16 = vadd.f32 %v713_v15, %v493_v12 }
 0x33b   : > { %721 = vst [vmem:[%s322_s17 + $0x28] sm:$0xff] %v714_v16 }
 0x33c   : > { %1035 = shalt.err (!%p1032_p9)
}
 0x33d   : > { %s1036_s22 = scalar_lea.hbm %s735_s1, 768  ;;  %s1040_s29 = scalar_lea.hbm %s1341_s7, 1536 }
 0x33e   : > { %p1037_p13 = scmp.ne.s32.totalorder %s735_s1, %s1036_s22  ;;  %p1041_p0 = scmp.lt.s32.totalorder %s735_s1, %s1341_s7 }
 0x33f   : > { %p1042_p4 = scmp.lt.s32.totalorder %s1040_s29, %s1036_s22 }
 0x340   : > { %p1038_p5 = pnand %p1037_p13, %p1361_p11 }
 0x341   : > { %p1043_p8 = por %p1042_p4, %p1041_p0 }
 0x342   : > { %p1039_p10 = pneg %p1038_p5 }
 0x344   : > { %p1044_p7 = pnand %p1043_p8, %p1039_p10 }
 0x346   : > { %1047 = shalt.err (!%p1044_p7)
}
 0x347   : > { %875 = dma.vmem_to_hbm [thread:$0]  (%p1361_p11), %s738_s12, 768, %s735_s1, %s723_s5  }
 0x348 PF: > { %s749_s17 = sand.u32 1, %s1078_s24   ;;  %p1362_p1 = scmp.ne.s32.totalorder %s1349_s8, 0 }
 0x349   : > { %p1363_p2 = scmp.ge.s32.totalorder %s1090_s27, 2  ;;  %s750_s21 = scalar_lea.sflag [#allocation4], %s749_s17 }
 0x34b   : > { %p889_p6 = pnand %p1363_p2, %p1362_p1 }
 0x34d   : > { %p890_p12 = pneg %p889_p6 }
 0x34f   : > { %1073 = dma.done.wait (%p890_p12), %s750_s21, 768  }
 0x350   : > { %1075 = vsyncadd (%p890_p12), %s750_s21, 4294966528  ;;  %p21_p3 = scmp.ge.s32.totalorder %s1214_s10, 4   ;;  %s1364_s24 = smov %s1082_s25 }
 0x351   : > { %s1365_s25 = smov %s1086_s26  ;;  %s1366_s26 = smov %s1223_s15 }
 0x352   : > { %s1367_s27 = smov %s1214_s10  ;;  %23 = sbr.rel (!%p21_p3) target bundleno = 9 (0x9), region = 101 }
 0x357   :  { %755 = vsyncpa [#allocation3], 1 }
 0x358   :  { %757 = vsyncpa [#allocation3 + $0x1], 1 }
 0x359   :  { %758 = vsyncpa [#allocation6], 1 }
 0x35a   :  { %759 = vsyncpa [#allocation4], 1 }
 0x35b   :  { %761 = vsyncpa [#allocation4 + $0x1], 1 }

</bundles_post_ra>
